<compile_context>
chip_gen: v7x
topology: tpu7x:2x2x1
jax: 0.10.0
libtpu: 0.0.40
codegen_flags: <defaults>
</compile_context>

<pallas_src>
import functools

import jax
import jax.numpy as jnp
from jax.experimental import pallas as pl
from jax.experimental.pallas import tpu as pltpu


def _round_up(a: int, b: int) -> int:
    return ((a + b - 1) // b) * b


def _largest_aligned_divisor(n: int, align: int, cap: int) -> int:
    """Largest d with d % align == 0, align <= d <= cap, and n % d == 0.

    `n` must be a positive multiple of `align`.
    """
    cap = min(cap, n)
    cap = max(align, cap - cap % align)
    d = cap
    while d >= align:
        if n % d == 0:
            return d
        d -= align
    return align


def _mosaic_params(dim_sem, vmem_need_bytes: int) -> pltpu.CompilerParams:
    kw = dict(dimension_semantics=dim_sem)
    # Only override the scoped-VMEM default when a custom tile config needs it
    # (smallest default across chips is ~16 MiB on v5e); keep headroom and
    # stay well under v7x's 64 MiB physical VMEM.
    if vmem_need_bytes > (14 << 20):
        kw["vmem_limit_bytes"] = int(min(
            vmem_need_bytes + (vmem_need_bytes >> 2) + (2 << 20), 56 << 20))
    return pltpu.CompilerParams(**kw)


# ---------------------------------------------------------------------------
# Kernels
# ---------------------------------------------------------------------------
def _mix_kernel(wb_ref, wv_ref, w_ref):
    # wb_ref: (nw, tk, tn) VMEM  (bank as W^T tiles: isize sublanes, osize lanes)
    # wv_ref: (nw,)        SMEM  (mixing coefficients, f32)
    # w_ref : (tk, tn)     VMEM  (W_eff^T tile, matmul compute dtype)
    nw = wb_ref.shape[0]
    acc = wv_ref[0] * wb_ref[0].astype(jnp.float32)
    for n in range(1, nw):                       # nw is small & static: unroll
        acc = acc + wv_ref[n] * wb_ref[n].astype(jnp.float32)
    w_ref[...] = acc.astype(w_ref.dtype)


def _linear_kernel(x_ref, w_ref, b_ref, o_ref, acc_ref, *, compute_dtype):
    # x_ref: (tm, tk)  w_ref: (tk, tn)  b_ref: (1, tn) f32  o_ref: (tm, tn)
    # acc_ref: (tm, tn) f32 scratch persisting across the k (reduction) axis.
    k = pl.program_id(2)

    @pl.when(k == 0)
    def _():
        acc_ref[...] = jnp.zeros_like(acc_ref)

    acc_ref[...] += jax.lax.dot_general(
        x_ref[...].astype(compute_dtype), w_ref[...],
        dimension_numbers=(((1,), (0,)), ((), ())),      # canonical NN matmul
        preferred_element_type=jnp.float32,
    )

    @pl.when(k == pl.num_programs(2) - 1)
    def _():
        o_ref[...] = (acc_ref[...] + b_ref[...]).astype(o_ref.dtype)


def _fused_kernel(x_ref, wb_ref, wv_ref, b_ref, o_ref, acc_ref, *, compute_dtype):
    # Small-M path: mix the bank tile in-register and matmul in one kernel so
    # W_eff never touches HBM and only one pallas_call is launched.
    # x_ref: (Mp, tk)  wb_ref: (nw, tk, tn)  wv_ref: (nw,) SMEM
    # b_ref: (1, tn) f32  o_ref: (Mp, tn)  acc_ref: (Mp, tn) f32
    k = pl.program_id(1)

    @pl.when(k == 0)
    def _():
        acc_ref[...] = jnp.zeros_like(acc_ref)

    nw = wb_ref.shape[0]
    w = wv_ref[0] * wb_ref[0].astype(jnp.float32)
    for n in range(1, nw):
        w = w + wv_ref[n] * wb_ref[n].astype(jnp.float32)

    acc_ref[...] += jax.lax.dot_general(
        x_ref[...].astype(compute_dtype), w.astype(compute_dtype),
        dimension_numbers=(((1,), (0,)), ((), ())),
        preferred_element_type=jnp.float32,
    )

    @pl.when(k == pl.num_programs(1) - 1)
    def _():
        o_ref[...] = (acc_ref[...] + b_ref[...]).astype(o_ref.dtype)


# ---------------------------------------------------------------------------
# Forward wrapper
# ---------------------------------------------------------------------------
def pshare_forward(x, wb_t, wvec, bias_p, *, osize, isize,
                   mxu_dtype=None, tm=512, tn=512, tk=512, mix_tile=512):
    """x: (..., isize) -> (..., osize).

    wb_t  : (nw, Kp, Np)  pre-transposed / zero-padded bank (see PShareLinear).
    wvec  : (nw,) f32     mixing coefficients.
    bias_p: (1, Np) f32   padded bias (zeros when the module has no bias).
    """
    nw, Kp, Np = wb_t.shape
    lead = x.shape[:-1]
    x2 = x.reshape(-1, isize)
    M = x2.shape[0]
    out_dtype = x.dtype
    compute_dtype = (jnp.dtype(mxu_dtype) if mxu_dtype is not None
                     else jnp.dtype(out_dtype))

    x_item = jnp.dtype(out_dtype).itemsize
    wb_item = jnp.dtype(wb_t.dtype).itemsize
    w_item = jnp.dtype(compute_dtype).itemsize

    # ---- tile selection: divisors of the 128-padded extents (no extra pad) --
    sub = max(8, 32 // x_item)                 # sublane multiple: f32 8, bf16 16
    tn_e = _largest_aligned_divisor(Np, 128, max(128, tn))
    tk_e = _largest_aligned_divisor(Kp, 128, max(128, tk))

    Msub = _round_up(M, sub)
    tm_a = max(sub, tm - tm % sub)
    d = _largest_aligned_divisor(Msub, sub, tm_a)
    if d >= max(sub, min(tm_a, Msub) // 4):    # good divisor -> no row padding
        tm_e, Mp = d, Msub
    else:
        tm_e = min(tm_a, Msub)
        Mp = _round_up(Msub, tm_e)

    # ---- pad the activation only when it is actually ragged -----------------
    x_p = x2
    if (Mp, Kp) != (M, isize):
        x_p = jnp.pad(x2, ((0, Mp - M), (0, Kp - isize)))

    n_j, n_k = Np // tn_e, Kp // tk_e

    # ---- small-M fused path --------------------------------------------------
    fused_need = (2 * Mp * tk_e * x_item + 2 * nw * tk_e * tn_e * wb_item
                  + 2 * Mp * tn_e * x_item + Mp * tn_e * 4
                  + tk_e * tn_e * (4 + w_item) + 2 * tn_e * 4)
    if Mp == tm_e and fused_need <= (20 << 20):
        # NOTE(v7x): a degenerate (1, 1) grid runs on one TensorCore only;
        # acceptable for decode/demo-sized problems.
        y_p = pl.pallas_call(
            functools.partial(_fused_kernel, compute_dtype=compute_dtype),
            out_shape=jax.ShapeDtypeStruct((Mp, Np), out_dtype),
            grid_spec=pltpu.PrefetchScalarGridSpec(
                num_scalar_prefetch=0,
                grid=(n_j, n_k),
                in_specs=[
                    pl.BlockSpec((Mp, tk_e), lambda j, k: (0, k)),           # x
                    pl.BlockSpec((nw, tk_e, tn_e), lambda j, k: (0, k, j)),  # bank
                    pl.BlockSpec(memory_space=pltpu.MemorySpace.SMEM),       # wvec
                    pl.BlockSpec((1, tn_e), lambda j, k: (0, j)),            # bias
                ],
                out_specs=pl.BlockSpec((Mp, tn_e), lambda j, k: (0, j)),
                scratch_shapes=[pltpu.VMEM((Mp, tn_e), jnp.float32)],
            ),
            compiler_params=_mosaic_params(("parallel", "arbitrary"), fused_need),
            cost_estimate=pl.CostEstimate(
                flops=2 * Mp * Np * Kp + 2 * nw * Np * Kp,
                transcendentals=0,
                bytes_accessed=(Mp * Kp * x_item + nw * Kp * Np * wb_item
                                + Mp * Np * x_item + Np * 4)),
        )(x_p, wb_t, wvec, bias_p)
    else:
        # ---- stage 1: mix the bank ONCE into lane-dense W_eff^T (Kp, Np) ----
        tk1 = _largest_aligned_divisor(Kp, 128, max(128, mix_tile))
        tn1 = _largest_aligned_divisor(Np, 128, max(128, mix_tile))
        mix_need = (2 * nw * tk1 * tn1 * wb_item + 2 * tk1 * tn1 * w_item
                    + tk1 * tn1 * 4)
        w_eff_t = pl.pallas_call(
            _mix_kernel,
            out_shape=jax.ShapeDtypeStruct((Kp, Np), compute_dtype),
            grid_spec=pltpu.PrefetchScalarGridSpec(
                num_scalar_prefetch=0,
                grid=(Kp // tk1, Np // tn1),
                in_specs=[
                    pl.BlockSpec((nw, tk1, tn1), lambda a, b: (0, a, b)),
                    pl.BlockSpec(memory_space=pltpu.MemorySpace.SMEM),
                ],
                out_specs=pl.BlockSpec((tk1, tn1), lambda a, b: (a, b)),
            ),
            compiler_params=_mosaic_params(("parallel", "parallel"), mix_need),
        )(wb_t, wvec)

        # ---- stage 2: tiled MXU matmul  y = x @ W_eff^T + b ------------------
        mm_need = (2 * tm_e * tk_e * x_item + 2 * tk_e * tn_e * w_item
                   + 2 * tm_e * tn_e * x_item + tm_e * tn_e * 4 + 2 * tn_e * 4)
        y_p = pl.pallas_call(
            functools.partial(_linear_kernel, compute_dtype=compute_dtype),
            out_shape=jax.ShapeDtypeStruct((Mp, Np), out_dtype),
            grid_spec=pltpu.PrefetchScalarGridSpec(
                num_scalar_prefetch=0,
                grid=(Mp // tm_e, n_j, n_k),
                in_specs=[
                    pl.BlockSpec((tm_e, tk_e), lambda i, j, k: (i, k)),   # x
                    pl.BlockSpec((tk_e, tn_e), lambda i, j, k: (k, j)),   # W_eff^T
                    pl.BlockSpec((1, tn_e), lambda i, j, k: (0, j)),      # bias
                ],
                out_specs=pl.BlockSpec((tm_e, tn_e), lambda i, j, k: (i, j)),
                scratch_shapes=[pltpu.VMEM((tm_e, tn_e), jnp.float32)],
            ),
            compiler_params=_mosaic_params(
                ("parallel", "parallel", "arbitrary"), mm_need),
            cost_estimate=pl.CostEstimate(
                flops=2 * Mp * Np * Kp,
                transcendentals=0,
                bytes_accessed=(Mp * Kp * x_item + Kp * Np * w_item
                                + Mp * Np * x_item + Np * 4)),
        )(x_p, w_eff_t, bias_p)

    y = y_p if (Mp, Np) == (M, osize) else y_p[:M, :osize]
    return y.reshape(*lead, osize)


class PShareLinear:
    """JAX/Pallas port of the PyTorch PShareLinear forward pass."""

    def __init__(self, weight_bank, weight, bias=None, *,
                 mxu_dtype=None, tm=512, tn=512, tk=512):
        osize, isize, nw = weight_bank.shape
        self.osize, self.isize, self.nw = osize, isize, nw
        Kp, Np = _round_up(isize, 128), _round_up(osize, 128)
        # One-time layout work (hoisted out of the per-call path): bank stored
        # as (nw, isize, osize), zero-padded so W_eff^T comes out lane-dense.
        wb_t = jnp.transpose(weight_bank, (2, 1, 0))
        self.wb_t = jnp.pad(wb_t, ((0, 0), (0, Kp - isize), (0, Np - osize)))
        self.wvec = weight.astype(jnp.float32)
        b = (jnp.zeros((osize,), jnp.float32) if bias is None
             else bias.astype(jnp.float32))
        self.bias_p = jnp.pad(b, (0, Np - osize)).reshape(1, Np)
        self.mxu_dtype, self.tm, self.tn, self.tk = mxu_dtype, tm, tn, tk

    def __call__(self, x):
        return pshare_forward(x, self.wb_t, self.wvec, self.bias_p,
                              osize=self.osize, isize=self.isize,
                              mxu_dtype=self.mxu_dtype,
                              tm=self.tm, tn=self.tn, tk=self.tk)


if __name__ == "__main__":
    # Small, module-consistent shapes.
    batch, seq = 2, 8
    osize, isize, nw = 32, 32, 4

    key = jax.random.PRNGKey(0)
    k_wb, k_w, k_x = jax.random.split(key, 3)

    # Deterministic parameter init (mirrors the module's __init__).
    wb = jax.random.normal(k_wb, (osize, isize, nw), dtype=jnp.float32)
    bound = 1.0 / float(nw) ** 0.5
    wvec = jax.random.uniform(k_w, (nw,), minval=-bound, maxval=bound,
                              dtype=jnp.float32)
    bias = jnp.zeros((osize,), dtype=jnp.float32)

    x = jax.random.normal(k_x, (batch, seq, isize), dtype=jnp.float32)

    # Pure-JAX reference for correctness (highest precision).
    w_eff_ref = (wb.reshape(-1, nw) @ wvec).reshape(osize, isize)
    y_ref = jnp.einsum("bsi,oi->bso", x, w_eff_ref,
                       precision=jax.lax.Precision.HIGHEST) + bias

    # 1) Default path: small M -> single fused pallas_call, f32 MXU.
    layer = PShareLinear(wb, wvec, bias)
    y = jax.block_until_ready(layer(x))
    assert y.shape == (batch, seq, osize)
    assert jnp.allclose(y, y_ref, atol=1e-3, rtol=1e-3), "fused path mismatch"

    # 2) Force the two-stage (mix-once + tiled matmul) path with tiny tiles.
    layer2 = PShareLinear(wb, wvec, bias, tm=8, tn=128, tk=128)
    y2 = jax.block_until_ready(layer2(x))
    assert jnp.allclose(y2, y_ref, atol=1e-3, rtol=1e-3), "two-stage mismatch"

    # 3) Optional bf16-MXU path (changes numerics slightly -> loose check).
    layer3 = PShareLinear(wb, wvec, bias, mxu_dtype=jnp.bfloat16)
    y3 = jax.block_until_ready(layer3(x))
    assert jnp.allclose(y3, y_ref, atol=5e-1, rtol=5e-2), "bf16 path mismatch"

    print("KERNEL_OK")
</pallas_src>

<mosaic_0001>
module attributes {stable_mosaic.version = 11 : i64} {
  func.func @_fused_kernel(%arg0: i32, %arg1: i32, %arg2: memref<16x128xf32, #tpu.memory_space<vmem>>, %arg3: memref<4x128x128xf32, #tpu.memory_space<vmem>>, %arg4: memref<4xf32, #tpu.memory_space<smem>>, %arg5: memref<1x128xf32, #tpu.memory_space<vmem>>, %arg6: memref<16x128xf32, #tpu.memory_space<vmem>>, %arg7: memref<16x128xf32, #tpu.memory_space<vmem>>) attributes {dimension_semantics = [#tpu.dimension_semantics<parallel>, #tpu.dimension_semantics<arbitrary>], iteration_bounds = array<i64: 1, 1>, scalar_prefetch = 0 : i64, scratch_operands = 1 : i64, tpu.core_type = #tpu.core_type<tc>, window_params = [{transform_indices = @transform_0, window_bounds = array<i64: 16, 128>}, {transform_indices = @transform_1, window_bounds = array<i64: 4, 128, 128>}, {transform_indices = @transform_2, window_bounds = array<i64: 4>}, {transform_indices = @transform_3, window_bounds = array<i64: 1, 128>}, {transform_indices = @transform_4, window_bounds = array<i64: 16, 128>}]} {
    %c0_i32 = arith.constant 0 : i32
    %0 = arith.cmpi eq, %arg1, %c0_i32 : i32
    %1 = arith.extui %0 : i1 to i32
    %c0_i32_0 = arith.constant 0 : i32
    %2 = arith.cmpi ne, %1, %c0_i32_0 : i32
    scf.if %2 {
      %cst_21 = arith.constant 0.000000e+00 : f32
      %34 = vector.broadcast %cst_21 : f32 to vector<16x128xf32>
      %c0_22 = arith.constant 0 : index
      %c0_23 = arith.constant 0 : index
      %35 = vector.load %arg7[%c0_22, %c0_23] : memref<16x128xf32, #tpu.memory_space<vmem>>, vector<16x128xf32>
      tpu.vector_store %arg7[%c0_22, %c0_23], %34 {strides = array<i32>} : memref<16x128xf32, #tpu.memory_space<vmem>>, vector<16x128xf32>,
    } else {
    }
    %c0 = arith.constant 0 : index
    %3 = memref.load %arg4[%c0] : memref<4xf32, #tpu.memory_space<smem>>
    %c0_1 = arith.constant 0 : index
    %c0_2 = arith.constant 0 : index
    %c0_3 = arith.constant 0 : index
    %4 = vector.load %arg3[%c0_1, %c0_2, %c0_3] : memref<4x128x128xf32, #tpu.memory_space<vmem>>, vector<1x128x128xf32>
    %5 = vector.shape_cast %4 : vector<1x128x128xf32> to vector<128x128xf32>
    %6 = vector.broadcast %3 : f32 to vector<128x128xf32>
    %7 = arith.mulf %6, %5 : vector<128x128xf32>
    %c1 = arith.constant 1 : index
    %8 = memref.load %arg4[%c1] : memref<4xf32, #tpu.memory_space<smem>>
    %c1_4 = arith.constant 1 : index
    %c0_5 = arith.constant 0 : index
    %c0_6 = arith.constant 0 : index
    %9 = vector.load %arg3[%c1_4, %c0_5, %c0_6] : memref<4x128x128xf32, #tpu.memory_space<vmem>>, vector<1x128x128xf32>
    %10 = vector.shape_cast %9 : vector<1x128x128xf32> to vector<128x128xf32>
    %11 = vector.broadcast %8 : f32 to vector<128x128xf32>
    %12 = arith.mulf %11, %10 : vector<128x128xf32>
    %13 = arith.addf %7, %12 : vector<128x128xf32>
    %c2 = arith.constant 2 : index
    %14 = memref.load %arg4[%c2] : memref<4xf32, #tpu.memory_space<smem>>
    %c2_7 = arith.constant 2 : index
    %c0_8 = arith.constant 0 : index
    %c0_9 = arith.constant 0 : index
    %15 = vector.load %arg3[%c2_7, %c0_8, %c0_9] : memref<4x128x128xf32, #tpu.memory_space<vmem>>, vector<1x128x128xf32>
    %16 = vector.shape_cast %15 : vector<1x128x128xf32> to vector<128x128xf32>
    %17 = vector.broadcast %14 : f32 to vector<128x128xf32>
    %18 = arith.mulf %17, %16 : vector<128x128xf32>
    %19 = arith.addf %13, %18 : vector<128x128xf32>
    %c3 = arith.constant 3 : index
    %20 = memref.load %arg4[%c3] : memref<4xf32, #tpu.memory_space<smem>>
    %c3_10 = arith.constant 3 : index
    %c0_11 = arith.constant 0 : index
    %c0_12 = arith.constant 0 : index
    %21 = vector.load %arg3[%c3_10, %c0_11, %c0_12] : memref<4x128x128xf32, #tpu.memory_space<vmem>>, vector<1x128x128xf32>
    %22 = vector.shape_cast %21 : vector<1x128x128xf32> to vector<128x128xf32>
    %23 = vector.broadcast %20 : f32 to vector<128x128xf32>
    %24 = arith.mulf %23, %22 : vector<128x128xf32>
    %25 = arith.addf %19, %24 : vector<128x128xf32>
    %c0_13 = arith.constant 0 : index
    %c0_14 = arith.constant 0 : index
    %26 = vector.load %arg7[%c0_13, %c0_14] : memref<16x128xf32, #tpu.memory_space<vmem>>, vector<16x128xf32>
    %c0_15 = arith.constant 0 : index
    %c0_16 = arith.constant 0 : index
    %27 = vector.load %arg2[%c0_15, %c0_16] : memref<16x128xf32, #tpu.memory_space<vmem>>, vector<16x128xf32>
    %cst = arith.constant dense<0.000000e+00> : vector<16x128xf32>
    %28 = tpu.matmul %27, %25, %cst {dimension_numbers = #tpu.dot_dimension_numbers<[1], [0], [0], [1], [0, 0, 1, 1], [], []>} : vector<16x128xf32>, vector<128x128xf32>, vector<16x128xf32> -> vector<16x128xf32>
    %29 = arith.addf %26, %28 : vector<16x128xf32>
    %c0_17 = arith.constant 0 : index
    %c0_18 = arith.constant 0 : index
    %30 = vector.load %arg7[%c0_17, %c0_18] : memref<16x128xf32, #tpu.memory_space<vmem>>, vector<16x128xf32>
    tpu.vector_store %arg7[%c0_17, %c0_18], %29 {strides = array<i32>} : memref<16x128xf32, #tpu.memory_space<vmem>>, vector<16x128xf32>,
    %c0_i32_19 = arith.constant 0 : i32
    %31 = arith.cmpi eq, %arg1, %c0_i32_19 : i32
    %32 = arith.extui %31 : i1 to i32
    %c0_i32_20 = arith.constant 0 : i32
    %33 = arith.cmpi ne, %32, %c0_i32_20 : i32
    scf.if %33 {
      %c0_21 = arith.constant 0 : index
      %c0_22 = arith.constant 0 : index
      %34 = vector.load %arg7[%c0_21, %c0_22] : memref<16x128xf32, #tpu.memory_space<vmem>>, vector<16x128xf32>
      %c0_23 = arith.constant 0 : index
      %c0_24 = arith.constant 0 : index
      %35 = vector.load %arg5[%c0_23, %c0_24] : memref<1x128xf32, #tpu.memory_space<vmem>>, vector<1x128xf32>
      %36 = vector.broadcast %35 : vector<1x128xf32> to vector<16x128xf32>
      %37 = arith.addf %34, %36 : vector<16x128xf32>
      %c0_25 = arith.constant 0 : index
      %c0_26 = arith.constant 0 : index
      %38 = vector.load %arg6[%c0_25, %c0_26] : memref<16x128xf32, #tpu.memory_space<vmem>>, vector<16x128xf32>
      tpu.vector_store %arg6[%c0_25, %c0_26], %37 {strides = array<i32>} : memref<16x128xf32, #tpu.memory_space<vmem>>, vector<16x128xf32>,
    } else {
    }
    return
  }
  func.func @transform_0(%arg0: i32, %arg1: i32) -> (i32, i32) {
    %c0_i32 = arith.constant 0 : i32
    %c0_i32_0 = arith.constant 0 : i32
    return %c0_i32, %arg1 : i32, i32
  }
  func.func @transform_1(%arg0: i32, %arg1: i32) -> (i32, i32, i32) {
    %c0_i32 = arith.constant 0 : i32
    %c0_i32_0 = arith.constant 0 : i32
    return %c0_i32, %arg1, %arg0 : i32, i32, i32
  }
  func.func @transform_2(%arg0: i32, %arg1: i32) -> i32 {
    %c0_i32 = arith.constant 0 : i32
    %c0_i32_0 = arith.constant 0 : i32
    return %c0_i32 : i32
  }
  func.func @transform_3(%arg0: i32, %arg1: i32) -> (i32, i32) {
    %c0_i32 = arith.constant 0 : i32
    %c0_i32_0 = arith.constant 0 : i32
    return %c0_i32, %arg0 : i32, i32
  }
  func.func @transform_4(%arg0: i32, %arg1: i32) -> (i32, i32) {
    %c0_i32 = arith.constant 0 : i32
    %c0_i32_0 = arith.constant 0 : i32
    return %c0_i32, %arg0 : i32, i32
  }
}

</mosaic_0001>

<bundles_post_ra>
// kernel: tpu_custom_call.1
= control target key start
LH: loop header
LB: loop body
LE: loop exit
PB: predicated region body
PF: predicated region fallthrough
CT: control target
= control target key end

     0   :  { %9 = vsyncpa [#allocation4], 0  ;;  %s705_s0 = inlined_call_operand.hbm [shape: f32[16,128], index: 0, kind: input, shape index: {}]   ;;  %s706_s1 = inlined_call_operand.hbm [shape: f32[4,128,128], index: 1, kind: input, shape index: {}]   ;;  %s707_s2 = inlined_call_operand.vmem [shape: f32[4], index: 2, kind: input, shape index: {}]   ;;  %s708_s3 = inlined_call_operand.vmem [shape: f32[1,128], index: 3, kind: input, shape index: {}]   ;;  %s709_s4 = inlined_call_operand.hbm [shape: f32[16,128], index: 4, kind: output, shape index: {}]  }
   0x1   :  { %10 = vsyncpa [#allocation8], 0 }
   0x2   :  { %11 = vsyncpa [#allocation6], 0 }
   0x3   :  { %12 = vsyncpa [#allocation5], 0  ;;  %s551_s15 = smov [#allocation3]   ;;  %s465_s19 = scalar_lea.hbm %s705_s0, 256 }
   0x4   :  { %s18_s16 = sshll.u32 %s551_s15, 4  ;;  %p466_p0 = scmp.ne.s32.totalorder %s705_s0, %s465_s19  ;;  %s19_s16 = int_to_ptr.vmem [resolvable:$true] %s18_s16 }
   0x5   :  { %p469_p1 = scmp.lt.u32.totalorder %s465_s19, %s705_s0 }
   0x7   :  { %p471_p2 = pnand %p469_p1, %p466_p0 }
   0x9   :  { %474 = shalt.err (!%p471_p2)
}
   0xa   :  { %s475_s24 = scalar_lea.vmem %s19_s16, 256  ;;  %p480_p4 = scmp.lt.s32.totalorder %s19_s16, %s19_s16 }
   0xb   :  { %p476_p3 = scmp.ne.s32.totalorder %s19_s16, %s475_s24  ;;  %p481_p5 = scmp.lt.s32.totalorder %s475_s24, %s475_s24 }
   0xd   :  { %p482_p6 = por %p481_p5, %p480_p4 }
   0xf   :  { %p483_p7 = pnand %p482_p6, %p476_p3 }
  0x11   :  { %486 = shalt.err (!%p483_p7)
}
  0x12   :  { %s552_s25 = smov 128   ;;  %s553_s26 = smov 8  }
  0x13   :  { %24 = dma.hbm_to_vmem [thread:$0]  %s705_s0, 256, %s19_s16, [#allocation4], %s552_s25, %s552_s25, %s553_s26  }
  0x14   :  { %s554_s29 = smov [#allocation7]   ;;  %s43_s7 = sshll.u32 %s707_s2, 4  ;;  %s44_s7 = int_to_ptr.vmem [resolvable:$true] %s43_s7 }
  0x15   :  { %s30_s30 = sshll.u32 %s554_s29, 4  ;;  %s487_s10 = scalar_lea.hbm %s706_s1, 8192  ;;  %s31_s30 = int_to_ptr.vmem [resolvable:$true] %s30_s30 }
  0x16   :  { %p488_p8 = scmp.ne.s32.totalorder %s706_s1, %s487_s10  ;;  %p491_p9 = scmp.lt.u32.totalorder %s487_s10, %s706_s1 }
  0x18   :  { %p493_p10 = pnand %p491_p9, %p488_p8 }
  0x1a   :  { %496 = shalt.err (!%p493_p10)
}
  0x1b   :  { %s497_s0 = scalar_lea.vmem %s31_s30, 8192  ;;  %p502_p12 = scmp.lt.s32.totalorder %s31_s30, %s31_s30 }
  0x1c   :  { %p498_p11 = scmp.ne.s32.totalorder %s31_s30, %s497_s0  ;;  %p503_p13 = scmp.lt.s32.totalorder %s497_s0, %s497_s0 }
  0x1e   :  { %p504_p0 = por %p503_p13, %p502_p12 }
  0x20   :  { %p505_p1 = pnand %p504_p0, %p498_p11 }
  0x22   :  { %508 = shalt.err (!%p505_p1)
}
  0x23   :  { %36 = dma.hbm_to_vmem [thread:$0]  %s706_s1, 8192, %s31_s30, [#allocation8], %s552_s25, %s552_s25, %s553_s26  }
  0x24   :  { %s509_s16 = scalar_lea.vmem %s44_s7, 16  ;;  %p514_p3 = scmp.lt.s32.totalorder %s44_s7, %s44_s7 }
  0x25   :  { %p510_p2 = scmp.ne.s32.totalorder %s44_s7, %s509_s16  ;;  %p515_p4 = scmp.lt.s32.totalorder %s509_s16, %s509_s16 }
  0x27   :  { %p516_p5 = por %p515_p4, %p514_p3 }
  0x29   :  { %p517_p6 = pnand %p516_p5, %p510_p2 }
  0x2b   :  { %520 = shalt.err (!%p517_p6)
}
  0x2c   :  { %s555_s17 = smov [#allocation9]  }
  0x2d   :  { %46 = dma.vmem_to_smem %s44_s7, 16, %s555_s17, [#allocation6]  }
  0x2e   :  { %543 = dma.done.wait [#allocation4], 256  }
  0x2f   :  { %544 = vsyncadd [#allocation4], 4294967040 }
  0x30   :  { %545 = dma.done.wait [#allocation8], 8192  }
  0x31   :  { %546 = vsyncadd [#allocation8], 4294959104 }
  0x32   :  { %547 = dma.done.wait [#allocation6], 16  }
  0x33   :  { %548 = vsyncadd [#allocation6], 4294967280 }
  0x34   :  { %58 = sfence }
  0x35   :  { %s65_s18 = sld [smem:[#allocation9]]  ;;  %s370_s19 = sld [smem:[#allocation9 + $0x1]]  ;;  %v66_v0 = vld [vmem:[#allocation7] sm:$0xff]  ;;  %v67_v1 = vld [vmem:[#allocation7 + $0x8] sm:$0xff]  ;;  %v68_v4 = vld [vmem:[#allocation7 + $0x10] sm:$0xff] }
  0x36   :  { %s371_s20 = sld [smem:[#allocation9 + $0x2]]  ;;  %s372_s1 = sld [smem:[#allocation9 + $0x3]]  ;;  %v101_v2 = vld [vmem:[#allocation7 + $0x80] sm:$0xff]  ;;  %v102_v3 = vld [vmem:[#allocation7 + $0x88] sm:$0xff]  ;;  %v69_v5 = vld [vmem:[#allocation7 + $0x18] sm:$0xff] }
  0x37   :  { %v152_v8 = vld [vmem:[#allocation7 + $0x100] sm:$0xff]  ;;  %v153_v9 = vld [vmem:[#allocation7 + $0x108] sm:$0xff]  ;;  %v103_v16 = vld [vmem:[#allocation7 + $0x90] sm:$0xff]  ;;  %s556_s23 = smov [#allocation10]  }
  0x38   :  { %v203_v10 = vld [vmem:[#allocation7 + $0x180] sm:$0xff]  ;;  %v204_v15 = vld [vmem:[#allocation7 + $0x188] sm:$0xff]  ;;  %v104_v17 = vld [vmem:[#allocation7 + $0x98] sm:$0xff]  ;;  %s356_s24 = sshll.u32 %s556_s23, 4  ;;  %s357_s24 = int_to_ptr.vmem [resolvable:$true] %s356_s24 }
  0x39   :  { %v154_v22 = vld [vmem:[#allocation7 + $0x110] sm:$0xff]  ;;  %v155_v23 = vld [vmem:[#allocation7 + $0x118] sm:$0xff]  ;;  %v70_v34 = vld [vmem:[#allocation7 + $0x20] sm:$0xff]  ;;  %s521_s27 = scalar_lea.vmem %s357_s24, 256  ;;  %p526_p8 = scmp.lt.s32.totalorder %s357_s24, %s357_s24 }
  0x3a   :  { %v205_v28 = vld [vmem:[#allocation7 + $0x190] sm:$0xff]  ;;  %v206_v29 = vld [vmem:[#allocation7 + $0x198] sm:$0xff]  ;;  %v71_v35 = vld [vmem:[#allocation7 + $0x28] sm:$0xff]  ;;  %p522_p7 = scmp.ne.s32.totalorder %s357_s24, %s521_s27  ;;  %p527_p9 = scmp.lt.s32.totalorder %s521_s27, %s521_s27 }
  0x3b   :  { %v615_v6 = vstv %s65_s18  ;;  %v617_v7 = vstv %s370_s19  ;;  %v105_v40 = vld [vmem:[#allocation7 + $0xa0] sm:$0xff]  ;;  %v106_v41 = vld [vmem:[#allocation7 + $0xa8] sm:$0xff]  ;;  %v72_v58 = vld [vmem:[#allocation7 + $0x30] sm:$0xff] }
  0x3c   :  { %v83_v11 = vmul.f32 %v615_v6, %v66_v0  ;;  %v84_v12 = vmul.f32 %v615_v6, %v67_v1  ;;  %v118_v13 = vmul.f32 %v617_v7, %v101_v2  ;;  %v119_v14 = vmul.f32 %v617_v7, %v102_v3  ;;  %v156_v46 = vld [vmem:[#allocation7 + $0x120] sm:$0xff]  ;;  %v157_v47 = vld [vmem:[#allocation7 + $0x128] sm:$0xff]  ;;  %v73_v59 = vld [vmem:[#allocation7 + $0x38] sm:$0xff]  ;;  %p528_p10 = por %p527_p9, %p526_p8 }
  0x3d   :  { %v623_v18 = vstv %s371_s20  ;;  %v625_v19 = vstv %s372_s1  ;;  %v85_v20 = vmul.f32 %v615_v6, %v68_v4  ;;  %v86_v21 = vmul.f32 %v615_v6, %v69_v5  ;;  %v207_v48 = vld [vmem:[#allocation7 + $0x1a0] sm:$0xff]  ;;  %v208_v53 = vld [vmem:[#allocation7 + $0x1a8] sm:$0xff]  ;;  %v107_v60 = vld [vmem:[#allocation7 + $0xb0] sm:$0xff] }
  0x3e   :  { %v134_v24 = vadd.f32 %v118_v13, %v83_v11  ;;  %v135_v25 = vadd.f32 %v119_v14, %v84_v12  ;;  %v169_v26 = vmul.f32 %v623_v18, %v152_v8  ;;  %v170_v27 = vmul.f32 %v623_v18, %v153_v9  ;;  %v108_v1 = vld [vmem:[#allocation7 + $0xb8] sm:$0xff]  ;;  %v158_v8 = vld [vmem:[#allocation7 + $0x130] sm:$0xff]  ;;  %p529_p11 = pnand %p528_p10, %p522_p7 }
  0x3f   :  { %v220_v30 = vmul.f32 %v625_v19, %v203_v10  ;;  %v221_v31 = vmul.f32 %v625_v19, %v204_v15  ;;  %v120_v32 = vmul.f32 %v617_v7, %v103_v16  ;;  %v121_v33 = vmul.f32 %v617_v7, %v104_v17  ;;  %v159_v9 = vld [vmem:[#allocation7 + $0x138] sm:$0xff]  ;;  %v209_v10 = vld [vmem:[#allocation7 + $0x1b0] sm:$0xff] }
  0x40   :  { %v185_v36 = vadd.f32 %v169_v26, %v134_v24  ;;  %v186_v37 = vadd.f32 %v170_v27, %v135_v25  ;;  %v171_v38 = vmul.f32 %v623_v18, %v154_v22  ;;  %v172_v39 = vmul.f32 %v623_v18, %v155_v23  ;;  %v210_v15 = vld [vmem:[#allocation7 + $0x1b8] sm:$0xff]  ;;  %v74_v22 = vld [vmem:[#allocation7 + $0x40] sm:$0xff]  ;;  %v75_v23 = vld [vmem:[#allocation7 + $0x48] sm:$0xff] }
  0x41   :  { %v136_v42 = vadd.f32 %v120_v32, %v85_v20  ;;  %v137_v43 = vadd.f32 %v121_v33, %v86_v21  ;;  %v222_v44 = vmul.f32 %v625_v19, %v205_v28  ;;  %v223_v45 = vmul.f32 %v625_v19, %v206_v29  ;;  %v109_v24 = vld [vmem:[#allocation7 + $0xc0] sm:$0xff]  ;;  %v110_v29 = vld [vmem:[#allocation7 + $0xc8] sm:$0xff] }
  0x42   :  { %v236_v49 = vadd.f32 %v220_v30, %v185_v36  ;;  %v237_v50 = vadd.f32 %v221_v31, %v186_v37  ;;  %v87_v51 = vmul.f32 %v615_v6, %v70_v34  ;;  %v88_v52 = vmul.f32 %v615_v6, %v71_v35  ;;  %v160_v30 = vld [vmem:[#allocation7 + $0x140] sm:$0xff]  ;;  %v161_v35 = vld [vmem:[#allocation7 + $0x148] sm:$0xff] }
  0x43   :  { %v187_v54 = vadd.f32 %v171_v38, %v136_v42  ;;  %v188_v55 = vadd.f32 %v172_v39, %v137_v43  ;;  %v122_v56 = vmul.f32 %v617_v7, %v105_v40  ;;  %v123_v57 = vmul.f32 %v617_v7, %v106_v41  ;;  %v211_v36 = vld [vmem:[#allocation7 + $0x1c0] sm:$0xff]  ;;  %v212_v41 = vld [vmem:[#allocation7 + $0x1c8] sm:$0xff]  ;;  %v76_v42 = vld [vmem:[#allocation7 + $0x50] sm:$0xff] }
  0x44   :  { %v427_v61 = vpack.c.bf16 %v237_v50, %v236_v49  ;;  %v173_v62 = vmul.f32 %v623_v18, %v156_v46  ;;  %v174_v63 = vmul.f32 %v623_v18, %v157_v47  ;;  %v224_v0 = vmul.f32 %v625_v19, %v207_v48  ;;  %v254_v43 = vld [vmem:[#allocation3] sm:$0xff]  ;;  %v77_v48 = vld [vmem:[#allocation7 + $0x58] sm:$0xff] }
  0x45   :  { %v238_v2 = vadd.f32 %v222_v44, %v187_v54  ;;  %v239_v3 = vadd.f32 %v223_v45, %v188_v55  ;;  %v138_v4 = vadd.f32 %v122_v56, %v87_v51  ;;  %v139_v5 = vadd.f32 %v123_v57, %v88_v52  ;;  %v111_v49 = vld [vmem:[#allocation7 + $0xd0] sm:$0xff]  ;;  %v112_v50 = vld [vmem:[#allocation7 + $0xd8] sm:$0xff]  ;;  %424 = vmatprep.mubr.f32.mxu0 %v254_v43 }
  0x46   :  { %428 = vmatprep.subr.bf16.mxu0 %v427_v61  ;;  %v225_v11 = vmul.f32 %v625_v19, %v208_v53  ;;  %v89_v12 = vmul.f32 %v615_v6, %v72_v58  ;;  %v90_v13 = vmul.f32 %v615_v6, %v73_v59  ;;  %v124_v14 = vmul.f32 %v617_v7, %v107_v60  ;;  %v162_v55 = vld [vmem:[#allocation7 + $0x150] sm:$0xff]  ;;  %v163_v56 = vld [vmem:[#allocation7 + $0x158] sm:$0xff] }
  0x47   :  { %430 = vmatpush3.bf16.msra.mxu0 %v427_v61  ;;  %v431_v16 = vpack.c.bf16 %v239_v3, %v238_v2  ;;  %v189_v17 = vadd.f32 %v173_v62, %v138_v4  ;;  %v190_v20 = vadd.f32 %v174_v63, %v139_v5  ;;  %v125_v21 = vmul.f32 %v617_v7, %v108_v1  ;;  %v213_v61 = vld [vmem:[#allocation7 + $0x1d0] sm:$0xff]  ;;  %v214_v2 = vld [vmem:[#allocation7 + $0x1d8] sm:$0xff]  ;;  %v78_v3 = vld [vmem:[#allocation7 + $0x60] sm:$0xff] }
  0x48   :  { %v140_v25 = vadd.f32 %v124_v14, %v89_v12  ;;  %v175_v26 = vmul.f32 %v623_v18, %v158_v8  ;;  %v176_v27 = vmul.f32 %v623_v18, %v159_v9  ;;  %v226_v28 = vmul.f32 %v625_v19, %v209_v10  ;;  %v79_v4 = vld [vmem:[#allocation7 + $0x68] sm:$0xff]  ;;  %v166_v43 = vld [vmem:[#allocation7 + $0x170] sm:$0xff] }
  0x49   :  { %432 = vmatprep.subr.bf16.mxu0 %v431_v16  ;;  %v240_v31 = vadd.f32 %v224_v0, %v189_v17  ;;  %v241_v32 = vadd.f32 %v225_v11, %v190_v20  ;;  %v141_v33 = vadd.f32 %v125_v21, %v90_v13  ;;  %v227_v34 = vmul.f32 %v625_v19, %v210_v15  ;;  %v113_v11 = vld [vmem:[#allocation7 + $0xe0] sm:$0xff]  ;;  %v114_v12 = vld [vmem:[#allocation7 + $0xe8] sm:$0xff] }
  0x4a   :  { %v191_v37 = vadd.f32 %v175_v26, %v140_v25  ;;  %v91_v38 = vmul.f32 %v615_v6, %v74_v22  ;;  %v92_v39 = vmul.f32 %v615_v6, %v75_v23  ;;  %v126_v40 = vmul.f32 %v617_v7, %v109_v24  ;;  %v164_v17 = vld [vmem:[#allocation7 + $0x160] sm:$0xff]  ;;  %v165_v20 = vld [vmem:[#allocation7 + $0x168] sm:$0xff] }
  0x4b   :  { %434 = vmatpush3.bf16.msra.mxu0 %v431_v16  ;;  %v435_v44 = vpack.c.bf16 %v241_v32, %v240_v31  ;;  %v192_v45 = vadd.f32 %v176_v27, %v141_v33  ;;  %v127_v46 = vmul.f32 %v617_v7, %v110_v29  ;;  %v177_v47 = vmul.f32 %v623_v18, %v160_v30  ;;  %v215_v21 = vld [vmem:[#allocation7 + $0x1e0] sm:$0xff]  ;;  %v216_v26 = vld [vmem:[#allocation7 + $0x1e8] sm:$0xff]  ;;  %v80_v31 = vld [vmem:[#allocation7 + $0x70] sm:$0xff] }
  0x4c   :  { %v242_v51 = vadd.f32 %v226_v28, %v191_v37  ;;  %v142_v52 = vadd.f32 %v126_v40, %v91_v38  ;;  %v178_v53 = vmul.f32 %v623_v18, %v161_v35  ;;  %v228_v54 = vmul.f32 %v625_v19, %v211_v36  ;;  %v81_v32 = vld [vmem:[#allocation7 + $0x78] sm:$0xff]  ;;  %v115_v33 = vld [vmem:[#allocation7 + $0xf0] sm:$0xff] }
  0x4d   :  { %436 = vmatprep.subr.bf16.mxu0 %v435_v44  ;;  %v243_v57 = vadd.f32 %v227_v34, %v192_v45  ;;  %v143_v58 = vadd.f32 %v127_v46, %v92_v39  ;;  %v229_v59 = vmul.f32 %v625_v19, %v212_v41  ;;  %v93_v60 = vmul.f32 %v615_v6, %v76_v42  ;;  %v116_v38 = vld [vmem:[#allocation7 + $0xf8] sm:$0xff]  ;;  %v217_v45 = vld [vmem:[#allocation7 + $0x1f0] sm:$0xff] }
  0x4e   :  { %v193_v62 = vadd.f32 %v177_v47, %v142_v52  ;;  %v94_v63 = vmul.f32 %v615_v6, %v77_v48  ;;  %v128_v0 = vmul.f32 %v617_v7, %v111_v49  ;;  %v129_v1 = vmul.f32 %v617_v7, %v112_v50  ;;  %v218_v50 = vld [vmem:[#allocation7 + $0x1f8] sm:$0xff] }
  0x4f   :  { %438 = vmatpush3.bf16.msra.mxu0 %v435_v44  ;;  %v439_v5 = vpack.c.bf16 %v243_v57, %v242_v51  ;;  %v194_v8 = vadd.f32 %v178_v53, %v143_v58  ;;  %v179_v9 = vmul.f32 %v623_v18, %v162_v55  ;;  %v180_v10 = vmul.f32 %v623_v18, %v163_v56  ;;  %v167_v44 = vld [vmem:[#allocation7 + $0x178] sm:$0xff] }
  0x50   :  { %v244_v13 = vadd.f32 %v228_v54, %v193_v62  ;;  %v144_v14 = vadd.f32 %v128_v0, %v93_v60  ;;  %v145_v15 = vadd.f32 %v129_v1, %v94_v63  ;;  %v230_v16 = vmul.f32 %v625_v19, %v213_v61 }
  0x51   :  { %440 = vmatprep.subr.bf16.mxu0 %v439_v5  ;;  %v245_v22 = vadd.f32 %v229_v59, %v194_v8  ;;  %v231_v23 = vmul.f32 %v625_v19, %v214_v2  ;;  %v95_v24 = vmul.f32 %v615_v6, %v78_v3  ;;  %v96_v25 = vmul.f32 %v615_v6, %v79_v4  ;;  %v373_v3 = vld [vmem:[%s708_s3] ss:$0 sm:$0xff] }
  0x52   :  { %v195_v27 = vadd.f32 %v179_v9, %v144_v14  ;;  %v196_v28 = vadd.f32 %v180_v10, %v145_v15  ;;  %v130_v29 = vmul.f32 %v617_v7, %v113_v11  ;;  %v131_v30 = vmul.f32 %v617_v7, %v114_v12 }
  0x53   :  { %442 = vmatpush3.bf16.msra.mxu0 %v439_v5  ;;  %v443_v34 = vpack.c.bf16 %v245_v22, %v244_v13  ;;  %v181_v35 = vmul.f32 %v623_v18, %v164_v17  ;;  %v182_v36 = vmul.f32 %v623_v18, %v165_v20  ;;  %v232_v37 = vmul.f32 %v625_v19, %v215_v21 }
  0x54   :  { %v246_v39 = vadd.f32 %v230_v16, %v195_v27  ;;  %v247_v40 = vadd.f32 %v231_v23, %v196_v28  ;;  %v146_v41 = vadd.f32 %v130_v29, %v95_v24  ;;  %v147_v42 = vadd.f32 %v131_v30, %v96_v25 }
  0x55   :  { %444 = vmatprep.subr.bf16.mxu0 %v443_v34  ;;  %v233_v46 = vmul.f32 %v625_v19, %v216_v26  ;;  %v97_v47 = vmul.f32 %v615_v6, %v80_v31  ;;  %v98_v48 = vmul.f32 %v615_v6, %v81_v32  ;;  %v132_v49 = vmul.f32 %v617_v7, %v115_v33 }
  0x56   :  { %v447_v51 = vpack.c.bf16 %v247_v40, %v246_v39  ;;  %v197_v52 = vadd.f32 %v181_v35, %v146_v41  ;;  %v198_v53 = vadd.f32 %v182_v36, %v147_v42  ;;  %v133_v54 = vmul.f32 %v617_v7, %v116_v38 }
  0x57   :  { %446 = vmatpush3.bf16.msra.mxu0 %v443_v34  ;;  %v148_v55 = vadd.f32 %v132_v49, %v97_v47  ;;  %v183_v56 = vmul.f32 %v623_v18, %v166_v43  ;;  %v184_v57 = vmul.f32 %v623_v18, %v167_v44  ;;  %v234_v58 = vmul.f32 %v625_v19, %v217_v45  ;;  %v255_v18 = vld [vmem:[#allocation3 + $0x8] sm:$0xff] }
  0x58   :  { %448 = vmatprep.subr.bf16.mxu0 %v447_v51  ;;  %v248_v59 = vadd.f32 %v232_v37, %v197_v52  ;;  %v249_v60 = vadd.f32 %v233_v46, %v198_v53  ;;  %v149_v6 = vadd.f32 %v133_v54, %v98_v48  ;;  %v235_v61 = vmul.f32 %v625_v19, %v218_v50 }
  0x59   :  { %v199_v62 = vadd.f32 %v183_v56, %v148_v55 }
  0x5a   :  { %v451_v63 = vpack.c.bf16 %v249_v60, %v248_v59  ;;  %v200_v0 = vadd.f32 %v184_v57, %v149_v6 }
  0x5b   :  { %450 = vmatpush3.bf16.msra.mxu0 %v447_v51  ;;  %v250_v1 = vadd.f32 %v234_v58, %v199_v62 }
  0x5c   :  { %452 = vmatprep.subr.bf16.mxu0 %v451_v63  ;;  %v251_v7 = vadd.f32 %v235_v61, %v200_v0 }
  0x5e   :  { %v455_v2 = vpack.c.bf16 %v251_v7, %v250_v1 }
  0x5f   :  { %454 = vmatpush3.bf16.msra.mxu0 %v451_v63 }
  0x60   :  { %456 = vmatprep.subr.bf16.mxu0 %v455_v2 }
  0x63   :  { %458 = vmatpush3.bf16.msra.mxu0 %v455_v2 }
  0x66   :  { %425 = vmatmul.mubr.f32.vlgmr.msra.gmra.mrb[0].mxu0 %v255_v18 }
 0x139   :  { %v426_v19 = vpop.f32.mrb[0].mxu0 }
 0x13a   :  { %v348_v4 = vadd.f32 %v426_v19, %v373_v3  ;;  %v322_v5 = vpop.f32.mrb[1].mxu0 }
 0x13b   :  { %v347_v8 = vadd.f32 %v373_v3, %v322_v5 }
 0x13c   :  { %350 = vst [vmem:[#allocation10 + $0x8] sm:$0xff] %v348_v4 }
 0x13d   :  { %349 = vst [vmem:[#allocation10] sm:$0xff] %v347_v8 }
 0x13e   :  { %532 = shalt.err (!%p529_p11)
}
 0x13f   :  { %s533_s3 = scalar_lea.hbm %s709_s4, 256 }
 0x140   :  { %p534_p12 = scmp.ne.s32.totalorder %s709_s4, %s533_s3  ;;  %p537_p13 = scmp.lt.u32.totalorder %s533_s3, %s709_s4 }
 0x142   :  { %p539_p0 = pnand %p537_p13, %p534_p12 }
 0x144   :  { %542 = shalt.err (!%p539_p0)
}
 0x145   :  { %362 = dma.vmem_to_hbm [thread:$0]  %s357_s24, 256, %s709_s4, [#allocation5], %s552_s25, %s552_s25, %s553_s26  }
 0x146   :  { %549 = dma.done.wait [#allocation5], 256  }
 0x147   :  { %550 = vsyncadd [#allocation5], 4294967040 }
 0x148   :  { %366 = vsyncpa [#allocation4], 1 }
 0x149   :  { %367 = vsyncpa [#allocation8], 1 }
 0x14a   :  { %368 = vsyncpa [#allocation5], 1 }
 0x14b   :  { %369 = vsyncpa [#allocation6], 1 }

</bundles_post_ra>
